<compile_context>
chip_gen: v6e
topology: v6e:2x2x1
jax: 0.10.0
libtpu: 0.0.40
codegen_flags: <defaults>
</compile_context>

<pallas_src>
import functools

import jax
import jax.numpy as jnp
from jax import lax
from jax.experimental import pallas as pl
from jax.experimental.pallas import tpu as pltpu


def _round_up(x, m):
    return (x + m - 1) // m * m


def _lstm_head_kernel(ns_ref, len_ref, xproj_ref, whh_ref, wd_ref, bd_ref,
                      out_ref, h_scr, c_scr, *, t_chunk, hidden_pad, nlabels):
    """One (batch-block, T-chunk) grid step.

    Grid = (batch_blocks, t_chunks); t is the inner ('arbitrary') axis, so the
    h/c scratch carries across T-chunks of one batch block and is re-initialised
    when a new batch block starts.
    """
    Hp = hidden_pad
    tc_idx = pl.program_id(1)
    chunk_start = tc_idx * t_chunk

    n_steps = ns_ref[0]                 # max sequence length in the batch
    min_len = ns_ref[1]                 # min sequence length in the batch
    lengths = len_ref[...]              # [Bb, 1] int32 (0 for padded rows)

    @pl.when(tc_idx == 0)
    def _():
        h_scr[...] = jnp.zeros_like(h_scr)
        c_scr[...] = jnp.zeros_like(c_scr)

    # Active steps in this chunk, and how many of them need no length masking.
    steps = jnp.clip(n_steps - chunk_start, 0, t_chunk)
    unmasked = jnp.clip(min_len - chunk_start, 0, steps)

    def cell(s, masked):
        h = h_scr[...]                  # [Bb, Hp] f32
        c = c_scr[...]
        # Input projection was hoisted to the wrapper; only the recurrent matmul here.
        gates = xproj_ref[s].astype(jnp.float32) + jnp.dot(
            h.astype(whh_ref.dtype), whh_ref[...],
            preferred_element_type=jnp.float32)
        # Gate order (re-packed in the wrapper): i, f, o, g  -> one contiguous
        # lane-aligned sigmoid block and one tanh block.
        sig = jax.nn.sigmoid(gates[:, :3 * Hp])
        i_g = sig[:, 0 * Hp:1 * Hp]
        f_g = sig[:, 1 * Hp:2 * Hp]
        o_g = sig[:, 2 * Hp:3 * Hp]
        g_g = jnp.tanh(gates[:, 3 * Hp:])
        c_new = f_g * c + i_g * g_g
        h_new = o_g * jnp.tanh(c_new)
        if masked:
            # Freeze state for rows whose sequence already ended (t >= length).
            m = lengths > (chunk_start + s)          # [Bb, 1] bool
            h_new = jnp.where(m, h_new, h)
            c_new = jnp.where(m, c_new, c)
        h_scr[...] = h_new
        c_scr[...] = c_new

    # Phase 1: every row still active (t < min length) -> no compare / selects.
    @pl.loop(0, unmasked)
    def _(s):
        cell(s, masked=False)

    # Phase 2: masked tail (some rows already finished).
    @pl.loop(unmasked, steps)
    def _(s):
        cell(s, masked=True)

    # Dense head + log_softmax once per batch block, on the last T-chunk.
    @pl.when(tc_idx == pl.num_programs(1) - 1)
    def _():
        logits = jnp.dot(h_scr[...].astype(wd_ref.dtype), wd_ref[...],
                         preferred_element_type=jnp.float32) + bd_ref[...]
        lane = lax.broadcasted_iota(jnp.int32, logits.shape, 1)
        logits = jnp.where(lane < nlabels, logits, -1e30)   # mask padded labels
        m = jnp.max(logits, axis=1, keepdims=True)
        lse = jnp.log(jnp.sum(jnp.exp(logits - m), axis=1, keepdims=True)) + m
        out_ref[...] = logits - lse


def _pad_gate_blocks(w, H, Hp, axis=0):
    """[i,f,g,o] gate blocks of width H along `axis` -> [i,f,o,g], zero-padded to Hp.

    Zero-padding invariant keeps padded hidden lanes inert (i=f=o=0.5, g=0 =>
    c,h stay 0) -- do not break it when refactoring.
    """
    i, f, g, o = jnp.split(w, 4, axis=axis)
    pad = [(0, 0)] * w.ndim
    pad[axis] = (0, Hp - H)
    return jnp.concatenate([jnp.pad(blk, pad) for blk in (i, f, o, g)], axis=axis)


def rnn_forward(x, lengths, params, *, weights_dtype=jnp.float32,
                t_chunk=None, num_batch_blocks=1):
    """x: [B, T, F] float32, lengths: [B] int. Returns log-probs [B, nlabels]
    in descending-length order (matching the PyTorch module's output order).

    num_batch_blocks=2 lets v7x's two TensorCores run independent batch blocks;
    keep 1 on single-TC chips. weights_dtype=jnp.bfloat16 halves weight/x_proj
    bytes on v6e/v7x (accumulation stays f32)."""
    B, T, F = x.shape
    H = params["w_hh"].shape[1]
    L = params["w_dense"].shape[0]

    Hp = _round_up(H, 128)                       # lane-align every gate block
    Lp = _round_up(L, 128)                       # lane-dense output stores
    nbb = max(1, int(num_batch_blocks))
    Bb = _round_up(-(-B // nbb), 8)              # rows per batch block (sublanes)
    Bp = Bb * nbb

    w_itemsize = jnp.dtype(weights_dtype).itemsize
    if t_chunk is None:
        # ~2 MiB per x_proj buffer (x2 double-buffering) so the next chunk's DMA
        # hides fully under the serial recurrence.
        row_bytes = Bb * 4 * Hp * w_itemsize
        t_chunk = int(max(8, min(256, (2 * 1024 * 1024) // max(row_bytes, 1))))
    t_chunk = int(max(1, min(t_chunk, T)))
    n_chunks = -(-T // t_chunk)
    T_pad = n_chunks * t_chunk

    # --- glue (plain JAX): sort by descending length (the module's output order).
    # NOTE: rows with equal lengths may be tie-ordered differently than torch.sort.
    order = jnp.argsort(-lengths)
    x_sorted = x[order].astype(jnp.float32)                  # [B, T, F]
    len_sorted = lengths[order].astype(jnp.int32)

    # --- weight prep: gate reorder [i,f,g,o]->[i,f,o,g], zero-pad H->Hp, L->Lp ---
    wih_p = _pad_gate_blocks(params["w_ih"], H, Hp, axis=0)                   # [4Hp, F]
    whh_p = _pad_gate_blocks(jnp.pad(params["w_hh"], ((0, 0), (0, Hp - H))),
                             H, Hp, axis=0)                                   # [4Hp, Hp]
    b_p = _pad_gate_blocks(params["b_ih"] + params["b_hh"], H, Hp, axis=0)    # [4Hp]
    wd_p = jnp.pad(params["w_dense"], ((0, Lp - L), (0, Hp - H)))             # [Lp, Hp]
    bd_p = jnp.pad(params["b_dense"], (0, Lp - L)).reshape(1, Lp).astype(jnp.float32)

    # --- hoisted input projection: one big GEMM over all timesteps, time-major out.
    # Default MXU precision (HIGHEST dropped): the only FLOP-heavy matmul here.
    xproj = jnp.einsum("btf,fg->tbg",
                       x_sorted.astype(weights_dtype),
                       wih_p.T.astype(weights_dtype),
                       preferred_element_type=jnp.float32)
    xproj = (xproj + b_p[None, None, :]).astype(weights_dtype)
    xproj = jnp.pad(xproj, ((0, T_pad - T), (0, Bp - B), (0, 0)))   # [T_pad, Bp, 4Hp]

    whh_t = whh_p.T.astype(weights_dtype)                           # [Hp, 4Hp]
    wd_t = wd_p.T.astype(weights_dtype)                             # [Hp, Lp]
    len_col = jnp.pad(len_sorted, (0, Bp - B)).reshape(Bp, 1)       # [Bp, 1] int32

    max_len = jnp.max(len_sorted).astype(jnp.int32)
    min_len = jnp.min(len_sorted).astype(jnp.int32)
    last_chunk = jnp.maximum(max_len - 1, 0) // t_chunk             # last active T-chunk
    nsteps = jnp.stack([max_len, min_len, last_chunk]).astype(jnp.int32)

    kernel = functools.partial(_lstm_head_kernel, t_chunk=t_chunk,
                               hidden_pad=Hp, nlabels=L)

    # Explicit VMEM limit sized to the double-buffered residency + headroom.
    vmem_bytes = (2 * t_chunk * Bb * 4 * Hp * w_itemsize            # x_proj chunk buffers
                  + 2 * Hp * 4 * Hp * w_itemsize                    # W_hh^T
                  + 2 * Hp * Lp * w_itemsize                        # W_dense^T
                  + 2 * Lp * 4                                      # b_dense
                  + 2 * Bb * 128 * 4                                # lengths (padded layout)
                  + 2 * Bb * Lp * 4                                 # output block
                  + 2 * Bb * Hp * 4)                                # h / c scratch
    vmem_limit = int(min(64 * 2**20, max(32 * 2**20, int(vmem_bytes * 1.5) + (2 << 20))))

    cost = pl.CostEstimate(
        flops=int(2 * T * Bp * Hp * 4 * Hp + 2 * Bp * Hp * Lp),
        transcendentals=int(5 * T * Bp * Hp + Bp * Lp),
        bytes_accessed=int(T_pad * Bp * 4 * Hp * w_itemsize + Hp * 4 * Hp * w_itemsize
                           + Hp * Lp * w_itemsize + Bp * Lp * 4),
    )

    grid_spec = pltpu.PrefetchScalarGridSpec(
        num_scalar_prefetch=1,
        grid=(nbb, n_chunks),
        in_specs=[
            pl.BlockSpec((Bb, 1), lambda b, t, ns: (b, 0)),                # lengths
            # Clamp the chunk index to the last active chunk: fully-padded tail
            # chunks keep the same block index, so no DMA is issued for them.
            pl.BlockSpec((t_chunk, Bb, 4 * Hp),
                         lambda b, t, ns: (jnp.minimum(t, ns[2]), b, 0)),  # x_proj
            pl.BlockSpec((Hp, 4 * Hp), lambda b, t, ns: (0, 0)),           # W_hh^T
            pl.BlockSpec((Hp, Lp), lambda b, t, ns: (0, 0)),               # W_dense^T
            pl.BlockSpec((1, Lp), lambda b, t, ns: (0, 0)),                # b_dense
        ],
        out_specs=pl.BlockSpec((Bb, Lp), lambda b, t, ns: (b, 0)),
        scratch_shapes=[
            pltpu.VMEM((Bb, Hp), jnp.float32),   # h state
            pltpu.VMEM((Bb, Hp), jnp.float32),   # c state
        ],
    )

    out_p = pl.pallas_call(
        kernel,
        out_shape=jax.ShapeDtypeStruct((Bp, Lp), jnp.float32),
        grid_spec=grid_spec,
        compiler_params=pltpu.CompilerParams(
            dimension_semantics=("parallel", "arbitrary"),
            vmem_limit_bytes=vmem_limit),
        cost_estimate=cost,
    )(nsteps, len_col, xproj, whh_t, wd_t, bd_p)

    return out_p[:B, :L]


def init_params(key, nfeats, nlabels, hidden_size):
    ks = jax.random.split(key, 6)
    s = 1.0 / jnp.sqrt(hidden_size)
    return {
        "w_ih": jax.random.uniform(ks[0], (4 * hidden_size, nfeats), jnp.float32, -s, s),
        "w_hh": jax.random.uniform(ks[1], (4 * hidden_size, hidden_size), jnp.float32, -s, s),
        "b_ih": jax.random.uniform(ks[2], (4 * hidden_size,), jnp.float32, -s, s),
        "b_hh": jax.random.uniform(ks[3], (4 * hidden_size,), jnp.float32, -s, s),
        "w_dense": jax.random.uniform(ks[4], (nlabels, hidden_size), jnp.float32, -s, s),
        "b_dense": jax.random.uniform(ks[5], (nlabels,), jnp.float32, -s, s),
    }


def _reference(x, lengths, params):
    """Pure-JAX reference of the same forward pass (sanity check)."""
    B, T, F = x.shape
    H = params["w_hh"].shape[1]
    order = jnp.argsort(-lengths)
    xs = jnp.transpose(x[order], (1, 0, 2))           # [T, B, F]
    ls = lengths[order].astype(jnp.int32)
    b = params["b_ih"] + params["b_hh"]

    def step(carry, inp):
        h, c = carry
        x_t, t = inp
        gates = x_t @ params["w_ih"].T + h @ params["w_hh"].T + b
        i = jax.nn.sigmoid(gates[:, 0 * H:1 * H])
        f = jax.nn.sigmoid(gates[:, 1 * H:2 * H])
        g = jnp.tanh(gates[:, 2 * H:3 * H])
        o = jax.nn.sigmoid(gates[:, 3 * H:4 * H])
        c_new = f * c + i * g
        h_new = o * jnp.tanh(c_new)
        m = (ls > t)[:, None]
        return (jnp.where(m, h_new, h), jnp.where(m, c_new, c)), None

    (h, _), _ = lax.scan(step, (jnp.zeros((B, H)), jnp.zeros((B, H))),
                         (xs, jnp.arange(T)))
    logits = h @ params["w_dense"].T + params["b_dense"]
    return jax.nn.log_softmax(logits, axis=1)


if __name__ == "__main__":
    nfeats, nlabels, hidden_size = 8, 5, 32
    key = jax.random.PRNGKey(0)
    kp, kx1, kx2 = jax.random.split(key, 3)
    params = init_params(kp, nfeats, nlabels, hidden_size)

    # --- test 1: small shapes, single T-chunk, single batch block ---
    B, T = 4, 8
    x = jax.random.normal(kx1, (B, T, nfeats), jnp.float32)
    lengths = jnp.array([5, 8, 3, 6], dtype=jnp.int32)
    out = jax.block_until_ready(jax.jit(rnn_forward)(x, lengths, params))
    ref = _reference(x, lengths, params)
    assert out.shape == (B, nlabels)
    assert jnp.allclose(out, ref, atol=2e-2, rtol=2e-2), "mismatch vs reference (test 1)"

    # --- test 2: streamed T-chunks + two parallel batch blocks + masked tail ---
    B2, T2 = 12, 40
    x2 = jax.random.normal(kx2, (B2, T2, nfeats), jnp.float32)
    lengths2 = jnp.array([40, 37, 3, 25, 12, 8, 40, 17, 5, 30, 22, 14], dtype=jnp.int32)
    fwd2 = jax.jit(functools.partial(rnn_forward, t_chunk=16, num_batch_blocks=2))
    out2 = jax.block_until_ready(fwd2(x2, lengths2, params))
    ref2 = _reference(x2, lengths2, params)
    assert out2.shape == (B2, nlabels)
    assert jnp.allclose(out2, ref2, atol=2e-2, rtol=2e-2), "mismatch vs reference (test 2)"

    print("KERNEL_OK")
</pallas_src>

<mosaic_0001>
module attributes {stable_mosaic.version = 11 : i64} {
  func.func @_lstm_head_kernel(%arg0: i32, %arg1: i32, %arg2: memref<3xi32, #tpu.memory_space<smem>>, %arg3: memref<8x1xi32, #tpu.memory_space<vmem>>, %arg4: memref<8x8x512xf32, #tpu.memory_space<vmem>>, %arg5: memref<128x512xf32, #tpu.memory_space<vmem>>, %arg6: memref<128x128xf32, #tpu.memory_space<vmem>>, %arg7: memref<1x128xf32, #tpu.memory_space<vmem>>, %arg8: memref<8x128xf32, #tpu.memory_space<vmem>>, %arg9: memref<8x128xf32, #tpu.memory_space<vmem>>, %arg10: memref<8x128xf32, #tpu.memory_space<vmem>>) attributes {dimension_semantics = [#tpu.dimension_semantics<parallel>, #tpu.dimension_semantics<arbitrary>], iteration_bounds = array<i64: 1, 1>, scalar_prefetch = 1 : i64, scratch_operands = 2 : i64, tpu.core_type = #tpu.core_type<tc>, window_params = [{transform_indices = @transform_0, window_bounds = array<i64: 8, 1>}, {transform_indices = @transform_1, window_bounds = array<i64: 8, 8, 512>}, {pipeline_mode = #tpu.pipeline_mode<synchronous>, transform_indices = @transform_2, window_bounds = array<i64: 128, 512>}, {pipeline_mode = #tpu.pipeline_mode<synchronous>, transform_indices = @transform_3, window_bounds = array<i64: 128, 128>}, {pipeline_mode = #tpu.pipeline_mode<synchronous>, transform_indices = @transform_4, window_bounds = array<i64: 1, 128>}, {transform_indices = @transform_5, window_bounds = array<i64: 8, 128>}]} {
    %c8_i32 = arith.constant 8 : i32
    %0 = arith.muli %arg1, %c8_i32 : i32
    %c0 = arith.constant 0 : index
    %1 = memref.load %arg2[%c0] : memref<3xi32, #tpu.memory_space<smem>>
    %c1 = arith.constant 1 : index
    %2 = memref.load %arg2[%c1] : memref<3xi32, #tpu.memory_space<smem>>
    %c0_0 = arith.constant 0 : index
    %c0_1 = arith.constant 0 : index
    %3 = vector.load %arg3[%c0_0, %c0_1] : memref<8x1xi32, #tpu.memory_space<vmem>>, vector<8x1xi32>
    %c0_i32 = arith.constant 0 : i32
    %4 = arith.cmpi eq, %arg1, %c0_i32 : i32
    %5 = arith.extui %4 : i1 to i32
    %c0_i32_2 = arith.constant 0 : i32
    %6 = arith.cmpi ne, %5, %c0_i32_2 : i32
    scf.if %6 {
      %cst = arith.constant 0.000000e+00 : f32
      %28 = vector.broadcast %cst : f32 to vector<8x128xf32>
      %c0_21 = arith.constant 0 : index
      %c0_22 = arith.constant 0 : index
      %29 = vector.load %arg9[%c0_21, %c0_22] : memref<8x128xf32, #tpu.memory_space<vmem>>, vector<8x128xf32>
      tpu.vector_store %arg9[%c0_21, %c0_22], %28 {strides = array<i32>} : memref<8x128xf32, #tpu.memory_space<vmem>>, vector<8x128xf32>,
      %cst_23 = arith.constant 0.000000e+00 : f32
      %30 = vector.broadcast %cst_23 : f32 to vector<8x128xf32>
      %c0_24 = arith.constant 0 : index
      %c0_25 = arith.constant 0 : index
      %31 = vector.load %arg10[%c0_24, %c0_25] : memref<8x128xf32, #tpu.memory_space<vmem>>, vector<8x128xf32>
      tpu.vector_store %arg10[%c0_24, %c0_25], %30 {strides = array<i32>} : memref<8x128xf32, #tpu.memory_space<vmem>>, vector<8x128xf32>,
    } else {
    }
    %7 = arith.subi %1, %0 : i32
    %c0_i32_3 = arith.constant 0 : i32
    %c8_i32_4 = arith.constant 8 : i32
    %8 = arith.maxsi %c0_i32_3, %7 : i32
    %9 = arith.minsi %c8_i32_4, %8 : i32
    %10 = arith.subi %2, %0 : i32
    %c0_i32_5 = arith.constant 0 : i32
    %11 = arith.maxsi %c0_i32_5, %10 : i32
    %12 = arith.minsi %9, %11 : i32
    %c0_i32_6 = arith.constant 0 : i32
    %13 = arith.subi %12, %c0_i32_6 : i32
    %c1_i32 = arith.constant 1 : i32
    %c1_i32_7 = arith.constant 1 : i32
    %14 = arith.subi %c1_i32, %c1_i32_7 : i32
    %15 = arith.addi %13, %14 : i32
    %c1_i32_8 = arith.constant 1 : i32
    %16 = arith.divsi %15, %c1_i32_8 : i32
    %c1_i32_9 = arith.constant 1 : i32
    %c0_i32_10 = arith.constant 0 : i32
    %c0_i32_11 = arith.constant 0 : i32
    %17 = arith.subi %16, %c0_i32_11 : i32
    %18 = arith.addi %c0_i32_11, %17 : i32
    %c1_i32_12 = arith.constant 1 : i32
    scf.for %arg11 = %c0_i32_11 to %18 step %c1_i32_12  : i32 {
      %28 = arith.muli %arg11, %c1_i32_9 : i32
      %29 = arith.addi %c0_i32_10, %28 : i32
      %c0_21 = arith.constant 0 : index
      %c0_22 = arith.constant 0 : index
      %30 = vector.load %arg9[%c0_21, %c0_22] : memref<8x128xf32, #tpu.memory_space<vmem>>, vector<8x128xf32>
      %c0_23 = arith.constant 0 : index
      %c0_24 = arith.constant 0 : index
      %31 = vector.load %arg10[%c0_23, %c0_24] : memref<8x128xf32, #tpu.memory_space<vmem>>, vector<8x128xf32>
      %32 = arith.index_cast %29 : i32 to index
      %c0_25 = arith.constant 0 : index
      %c0_26 = arith.constant 0 : index
      %33 = vector.load %arg4[%32, %c0_25, %c0_26] : memref<8x8x512xf32, #tpu.memory_space<vmem>>, vector<1x8x512xf32>
      %34 = vector.shape_cast %33 : vector<1x8x512xf32> to vector<8x512xf32>
      %c0_27 = arith.constant 0 : index
      %c0_28 = arith.constant 0 : index
      %35 = vector.load %arg5[%c0_27, %c0_28] : memref<128x512xf32, #tpu.memory_space<vmem>>, vector<128x512xf32>
      %cst = arith.constant dense<0.000000e+00> : vector<8x512xf32>
      %36 = tpu.matmul %30, %35, %cst {dimension_numbers = #tpu.dot_dimension_numbers<[1], [0], [0], [1], [0, 0, 1, 1], [], []>} : vector<8x128xf32>, vector<128x512xf32>, vector<8x512xf32> -> vector<8x512xf32>
      %37 = arith.addf %34, %36 : vector<8x512xf32>
      %38 = vector.extract_strided_slice %37 {offsets = [0, 0], sizes = [8, 384], strides = [1, 1]} : vector<8x512xf32> to vector<8x384xf32>
      %39 = arith.negf %38 : vector<8x384xf32>
      %40 = math.exp %39 : vector<8x384xf32>
      %cst_29 = arith.constant 1.000000e+00 : f32
      %41 = vector.broadcast %cst_29 : f32 to vector<8x384xf32>
      %42 = arith.addf %41, %40 : vector<8x384xf32>
      %43 = arith.divf %41, %42 : vector<8x384xf32>
      %44 = vector.extract_strided_slice %43 {offsets = [0, 0], sizes = [8, 128], strides = [1, 1]} : vector<8x384xf32> to vector<8x128xf32>
      %45 = vector.extract_strided_slice %43 {offsets = [0, 128], sizes = [8, 128], strides = [1, 1]} : vector<8x384xf32> to vector<8x128xf32>
      %46 = vector.extract_strided_slice %43 {offsets = [0, 256], sizes = [8, 128], strides = [1, 1]} : vector<8x384xf32> to vector<8x128xf32>
      %47 = vector.extract_strided_slice %37 {offsets = [0, 384], sizes = [8, 128], strides = [1, 1]} : vector<8x512xf32> to vector<8x128xf32>
      %48 = math.tanh %47 : vector<8x128xf32>
      %49 = arith.mulf %45, %31 : vector<8x128xf32>
      %50 = arith.mulf %44, %48 : vector<8x128xf32>
      %51 = arith.addf %49, %50 : vector<8x128xf32>
      %52 = math.tanh %51 : vector<8x128xf32>
      %53 = arith.mulf %46, %52 : vector<8x128xf32>
      %c0_30 = arith.constant 0 : index
      %c0_31 = arith.constant 0 : index
      %54 = vector.load %arg9[%c0_30, %c0_31] : memref<8x128xf32, #tpu.memory_space<vmem>>, vector<8x128xf32>
      tpu.vector_store %arg9[%c0_30, %c0_31], %53 {strides = array<i32>} : memref<8x128xf32, #tpu.memory_space<vmem>>, vector<8x128xf32>,
      %c0_32 = arith.constant 0 : index
      %c0_33 = arith.constant 0 : index
      %55 = vector.load %arg10[%c0_32, %c0_33] : memref<8x128xf32, #tpu.memory_space<vmem>>, vector<8x128xf32>
      tpu.vector_store %arg10[%c0_32, %c0_33], %51 {strides = array<i32>} : memref<8x128xf32, #tpu.memory_space<vmem>>, vector<8x128xf32>,
    }
    %19 = arith.subi %9, %12 : i32
    %c1_i32_13 = arith.constant 1 : i32
    %c1_i32_14 = arith.constant 1 : i32
    %20 = arith.subi %c1_i32_13, %c1_i32_14 : i32
    %21 = arith.addi %19, %20 : i32
    %c1_i32_15 = arith.constant 1 : i32
    %22 = arith.divsi %21, %c1_i32_15 : i32
    %c1_i32_16 = arith.constant 1 : i32
    %c0_i32_17 = arith.constant 0 : i32
    %23 = arith.subi %22, %c0_i32_17 : i32
    %24 = arith.addi %c0_i32_17, %23 : i32
    %c1_i32_18 = arith.constant 1 : i32
    scf.for %arg11 = %c0_i32_17 to %24 step %c1_i32_18  : i32 {
      %28 = arith.muli %arg11, %c1_i32_16 : i32
      %29 = arith.addi %12, %28 : i32
      %c0_21 = arith.constant 0 : index
      %c0_22 = arith.constant 0 : index
      %30 = vector.load %arg9[%c0_21, %c0_22] : memref<8x128xf32, #tpu.memory_space<vmem>>, vector<8x128xf32>
      %c0_23 = arith.constant 0 : index
      %c0_24 = arith.constant 0 : index
      %31 = vector.load %arg10[%c0_23, %c0_24] : memref<8x128xf32, #tpu.memory_space<vmem>>, vector<8x128xf32>
      %32 = arith.index_cast %29 : i32 to index
      %c0_25 = arith.constant 0 : index
      %c0_26 = arith.constant 0 : index
      %33 = vector.load %arg4[%32, %c0_25, %c0_26] : memref<8x8x512xf32, #tpu.memory_space<vmem>>, vector<1x8x512xf32>
      %34 = vector.shape_cast %33 : vector<1x8x512xf32> to vector<8x512xf32>
      %c0_27 = arith.constant 0 : index
      %c0_28 = arith.constant 0 : index
      %35 = vector.load %arg5[%c0_27, %c0_28] : memref<128x512xf32, #tpu.memory_space<vmem>>, vector<128x512xf32>
      %cst = arith.constant dense<0.000000e+00> : vector<8x512xf32>
      %36 = tpu.matmul %30, %35, %cst {dimension_numbers = #tpu.dot_dimension_numbers<[1], [0], [0], [1], [0, 0, 1, 1], [], []>} : vector<8x128xf32>, vector<128x512xf32>, vector<8x512xf32> -> vector<8x512xf32>
      %37 = arith.addf %34, %36 : vector<8x512xf32>
      %38 = vector.extract_strided_slice %37 {offsets = [0, 0], sizes = [8, 384], strides = [1, 1]} : vector<8x512xf32> to vector<8x384xf32>
      %39 = arith.negf %38 : vector<8x384xf32>
      %40 = math.exp %39 : vector<8x384xf32>
      %cst_29 = arith.constant 1.000000e+00 : f32
      %41 = vector.broadcast %cst_29 : f32 to vector<8x384xf32>
      %42 = arith.addf %41, %40 : vector<8x384xf32>
      %43 = arith.divf %41, %42 : vector<8x384xf32>
      %44 = vector.extract_strided_slice %43 {offsets = [0, 0], sizes = [8, 128], strides = [1, 1]} : vector<8x384xf32> to vector<8x128xf32>
      %45 = vector.extract_strided_slice %43 {offsets = [0, 128], sizes = [8, 128], strides = [1, 1]} : vector<8x384xf32> to vector<8x128xf32>
      %46 = vector.extract_strided_slice %43 {offsets = [0, 256], sizes = [8, 128], strides = [1, 1]} : vector<8x384xf32> to vector<8x128xf32>
      %47 = vector.extract_strided_slice %37 {offsets = [0, 384], sizes = [8, 128], strides = [1, 1]} : vector<8x512xf32> to vector<8x128xf32>
      %48 = math.tanh %47 : vector<8x128xf32>
      %49 = arith.mulf %45, %31 : vector<8x128xf32>
      %50 = arith.mulf %44, %48 : vector<8x128xf32>
      %51 = arith.addf %49, %50 : vector<8x128xf32>
      %52 = math.tanh %51 : vector<8x128xf32>
      %53 = arith.mulf %46, %52 : vector<8x128xf32>
      %54 = arith.addi %0, %29 : i32
      %55 = vector.broadcast %54 : i32 to vector<8x1xi32>
      %56 = arith.cmpi sgt, %3, %55 : vector<8x1xi32>
      %57 = vector.shape_cast %56 : vector<8x1xi1> to vector<8x1xi1>
      %58 = vector.broadcast %57 : vector<8x1xi1> to vector<8x128xi1>
      %59 = arith.select %58, %53, %30 : vector<8x128xi1>, vector<8x128xf32>
      %60 = vector.shape_cast %56 : vector<8x1xi1> to vector<8x1xi1>
      %61 = vector.broadcast %60 : vector<8x1xi1> to vector<8x128xi1>
      %62 = arith.select %61, %51, %31 : vector<8x128xi1>, vector<8x128xf32>
      %c0_30 = arith.constant 0 : index
      %c0_31 = arith.constant 0 : index
      %63 = vector.load %arg9[%c0_30, %c0_31] : memref<8x128xf32, #tpu.memory_space<vmem>>, vector<8x128xf32>
      tpu.vector_store %arg9[%c0_30, %c0_31], %59 {strides = array<i32>} : memref<8x128xf32, #tpu.memory_space<vmem>>, vector<8x128xf32>,
      %c0_32 = arith.constant 0 : index
      %c0_33 = arith.constant 0 : index
      %64 = vector.load %arg10[%c0_32, %c0_33] : memref<8x128xf32, #tpu.memory_space<vmem>>, vector<8x128xf32>
      tpu.vector_store %arg10[%c0_32, %c0_33], %62 {strides = array<i32>} : memref<8x128xf32, #tpu.memory_space<vmem>>, vector<8x128xf32>,
    }
    %c0_i32_19 = arith.constant 0 : i32
    %25 = arith.cmpi eq, %arg1, %c0_i32_19 : i32
    %26 = arith.extui %25 : i1 to i32
    %c0_i32_20 = arith.constant 0 : i32
    %27 = arith.cmpi ne, %26, %c0_i32_20 : i32
    scf.if %27 {
      %c0_21 = arith.constant 0 : index
      %c0_22 = arith.constant 0 : index
      %28 = vector.load %arg9[%c0_21, %c0_22] : memref<8x128xf32, #tpu.memory_space<vmem>>, vector<8x128xf32>
      %c0_23 = arith.constant 0 : index
      %c0_24 = arith.constant 0 : index
      %29 = vector.load %arg6[%c0_23, %c0_24] : memref<128x128xf32, #tpu.memory_space<vmem>>, vector<128x128xf32>
      %cst = arith.constant dense<0.000000e+00> : vector<8x128xf32>
      %30 = tpu.matmul %28, %29, %cst {dimension_numbers = #tpu.dot_dimension_numbers<[1], [0], [0], [1], [0, 0, 1, 1], [], []>} : vector<8x128xf32>, vector<128x128xf32>, vector<8x128xf32> -> vector<8x128xf32>
      %c0_25 = arith.constant 0 : index
      %c0_26 = arith.constant 0 : index
      %31 = vector.load %arg7[%c0_25, %c0_26] : memref<1x128xf32, #tpu.memory_space<vmem>>, vector<1x128xf32>
      %32 = vector.broadcast %31 : vector<1x128xf32> to vector<8x128xf32>
      %33 = arith.addf %30, %32 : vector<8x128xf32>
      %34 = tpu.iota {dimensions = array<i32: 1>} : vector<8x128xi32>
      %c5_i32 = arith.constant 5 : i32
      %35 = vector.broadcast %c5_i32 : i32 to vector<8x128xi32>
      %36 = arith.cmpi slt, %34, %35 : vector<8x128xi32>
      %cst_27 = arith.constant -1.000000e+30 : f32
      %37 = vector.broadcast %cst_27 : f32 to vector<8x128xf32>
      %38 = arith.select %36, %33, %37 : vector<8x128xi1>, vector<8x128xf32>
      %cst_28 = arith.constant dense<0xFF800000> : vector<8xf32>
      %39 = vector.multi_reduction <maximumf>, %38, %cst_28 [1] : vector<8x128xf32> to vector<8xf32>
      %40 = vector.shape_cast %39 : vector<8xf32> to vector<8x1xf32>
      %41 = vector.broadcast %40 : vector<8x1xf32> to vector<8x128xf32>
      %42 = arith.subf %38, %41 : vector<8x128xf32>
      %43 = math.exp %42 : vector<8x128xf32>
      %cst_29 = arith.constant dense<0.000000e+00> : vector<8xf32>
      %44 = vector.multi_reduction <add>, %43, %cst_29 [1] : vector<8x128xf32> to vector<8xf32>
      %45 = vector.shape_cast %44 : vector<8xf32> to vector<8x1xf32>
      %46 = math.log %45 : vector<8x1xf32>
      %47 = arith.addf %46, %40 : vector<8x1xf32>
      %48 = vector.broadcast %47 : vector<8x1xf32> to vector<8x128xf32>
      %49 = arith.subf %38, %48 : vector<8x128xf32>
      %c0_30 = arith.constant 0 : index
      %c0_31 = arith.constant 0 : index
      %50 = vector.load %arg8[%c0_30, %c0_31] : memref<8x128xf32, #tpu.memory_space<vmem>>, vector<8x128xf32>
      tpu.vector_store %arg8[%c0_30, %c0_31], %49 {strides = array<i32>} : memref<8x128xf32, #tpu.memory_space<vmem>>, vector<8x128xf32>,
    } else {
    }
    return
  }
  func.func @transform_0(%arg0: i32, %arg1: i32, %arg2: memref<3xi32, #tpu.memory_space<smem>>) -> (i32, i32) {
    %c0_i32 = arith.constant 0 : i32
    %c0_i32_0 = arith.constant 0 : i32
    return %arg0, %c0_i32 : i32, i32
  }
  func.func @transform_1(%arg0: i32, %arg1: i32, %arg2: memref<3xi32, #tpu.memory_space<smem>>) -> (i32, i32, i32) {
    %c2 = arith.constant 2 : index
    %0 = memref.load %arg2[%c2] : memref<3xi32, #tpu.memory_space<smem>>
    %1 = arith.minsi %arg1, %0 : i32
    %c0_i32 = arith.constant 0 : i32
    %c0_i32_0 = arith.constant 0 : i32
    return %1, %arg0, %c0_i32 : i32, i32, i32
  }
  func.func @transform_2(%arg0: i32, %arg1: i32, %arg2: memref<3xi32, #tpu.memory_space<smem>>) -> (i32, i32) {
    %c0_i32 = arith.constant 0 : i32
    %c0_i32_0 = arith.constant 0 : i32
    %c0_i32_1 = arith.constant 0 : i32
    return %c0_i32, %c0_i32_0 : i32, i32
  }
  func.func @transform_3(%arg0: i32, %arg1: i32, %arg2: memref<3xi32, #tpu.memory_space<smem>>) -> (i32, i32) {
    %c0_i32 = arith.constant 0 : i32
    %c0_i32_0 = arith.constant 0 : i32
    %c0_i32_1 = arith.constant 0 : i32
    return %c0_i32, %c0_i32_0 : i32, i32
  }
  func.func @transform_4(%arg0: i32, %arg1: i32, %arg2: memref<3xi32, #tpu.memory_space<smem>>) -> (i32, i32) {
    %c0_i32 = arith.constant 0 : i32
    %c0_i32_0 = arith.constant 0 : i32
    %c0_i32_1 = arith.constant 0 : i32
    return %c0_i32, %c0_i32_0 : i32, i32
  }
  func.func @transform_5(%arg0: i32, %arg1: i32, %arg2: memref<3xi32, #tpu.memory_space<smem>>) -> (i32, i32) {
    %c0_i32 = arith.constant 0 : i32
    %c0_i32_0 = arith.constant 0 : i32
    return %arg0, %c0_i32 : i32, i32
  }
}

</mosaic_0001>

<bundles_post_ra>
// kernel: neg.1
= control target key start
LH: loop header
LB: loop body
LE: loop exit
PB: predicated region body
PF: predicated region fallthrough
CT: control target
= control target key end

     0   :  { %s24_s0 = inlined_call_operand.vmem [shape: s32[4], index: 0, kind: input, shape index: {}]   ;;  %s25_s1 = inlined_call_operand.vmem [shape: s32[4], index: 1, kind: output, shape index: {}]  }
   0x1   :  { %v2_v0 = vld [vmem:[%s24_s0] sm:$0x1] }
   0x2   :  { %v5_v1 = vsub.s32 0, %v2_v0 }
   0x4   :  { %7 = vst [vmem:[%s25_s1] sm:$0x1] %v5_v1 }

// kernel: rnn_forward.1
= control target key start
LH: loop header
LB: loop body
LE: loop exit
PB: predicated region body
PF: predicated region fallthrough
CT: control target
= control target key end

     0   :  { %s1462_s0 = inlined_call_operand.vmem [shape: s32[3], index: 0, kind: input, shape index: {}]   ;;  %s1463_s1 = inlined_call_operand.vmem [shape: s32[8,1], index: 1, kind: input, shape index: {}]   ;;  %s1464_s2 = inlined_call_operand.vmem [shape: f32[8,8,512], index: 2, kind: input, shape index: {}]   ;;  %s1465_s3 = inlined_call_operand.vmem [shape: f32[128,512], index: 3, kind: input, shape index: {}]   ;;  %s1466_s4 = inlined_call_operand.vmem [shape: f32[128,128], index: 4, kind: input, shape index: {}]   ;;  %s1467_s5 = inlined_call_operand.vmem [shape: f32[1,128], index: 5, kind: input, shape index: {}]   ;;  %s1468_s6 = inlined_call_operand.vmem [shape: f32[8,128], index: 6, kind: output, shape index: {}]  }
   0x1   :  { %s11_s23 = sshll.u32 %s1462_s0, 4  ;;  %s12_s23 = int_to_ptr.vmem [resolvable:$true] %s11_s23 }
   0x2   :  { %s874_s24 = scalar_lea.vmem %s12_s23, 16  ;;  %p879_p1 = scmp.lt.s32.totalorder %s12_s23, %s12_s23 }
   0x3   :  { %p875_p0 = scmp.ne.s32.totalorder %s12_s23, %s874_s24  ;;  %p880_p2 = scmp.lt.s32.totalorder %s874_s24, %s874_s24 }
   0x5   :  { %p881_p3 = por %p880_p2, %p879_p1 }
   0x7   :  { %p882_p4 = pnand %p881_p3, %p875_p0 }
   0x9   :  { %885 = shalt.err (!%p882_p4)  }
   0xa   :  { %s904_s25 = smov [#allocation5]  }
   0xb   :  { %14 = dma.vmem_to_smem %s12_s23, 16, %s904_s25, [#allocation4] }
   0xc   :  { %894 = dma.done.wait [#allocation4], 16 }
   0xd   :  { %895 = vsyncadd [#allocation4], 4294967280 }
   0xe   :  { %16 = sfence }
   0xf   :  { %s734_s26 = sld [smem:[#allocation5 + $0x2]]  ;;  %v951_v0 = vld [vmem:[%s1463_s1] sm:$0xff]  ;;  %v905_v1 = vmov 0.0  }
  0x10   :  { %s63_s0 = sld [smem:[#allocation5]]  ;;  %70 = vst [vmem:[#allocation2] sm:$0xff] %v905_v1  ;;  %71 = vst [vmem:[#allocation3] sm:$0xff] %v905_v1 }
  0x11   :  { %s739_s29 = sld [smem:[#allocation5 + $0x1]] }
  0x15   :  { %p735_p5 = scmp.gt.s32.totalorder %s734_s26, 0 }
  0x16   :  { %p73_p6 = scmp.gt.s32.totalorder %s63_s0, 0  ;;  %p740_p7 = scmp.lt.s32.totalorder %s63_s0, 8 }
  0x17   :  { %s1470_s26 = smov (%p735_p5, %s734_s26), 0  ;;  %p78_p8 = scmp.gt.s32.totalorder %s739_s29, 0 }
  0x18   :  { %s1472_s0 = smov (!%p73_p6, %s63_s0), 0  ;;  %s736_s30 = sshll.u32 %s1470_s26, 3 }
  0x19   :  { %p53_p9 = scmp.lt.s32.totalorder %s736_s30, 7  ;;  %s1474_s0 = smov (!%p740_p7, %s1472_s0), 8 }
  0x1a   :  { %s1478_s29 = smov (!%p78_p8, %s739_s29), 0 }
  0x1b   :  { %s1476_s30 = smov (!%p53_p9, %s736_s30), 7  ;;  %p80_p10 = scmp.lt.s32.totalorder %s1474_s0, %s1478_s29 }
  0x1c   :  { %s758_s1 = sshll.u32 %s1476_s30, 5 }
  0x1d   :  { %s960_s9 = scalar_lea.vmem %s1464_s2, %s758_s1 }
  0x1e   :  { %s964_s10 = scalar_select %p80_p10, %s1474_s0, %s1478_s29 }
  0x20   :  { %p745_p11 = scmp.le.s32.totalorder %s964_s10, 0 }
  0x21   :  { %s967_s11 = smov (!%p745_p11), 0  }
  0x22   :  { %726 = sbr.rel (%p745_p11) target bundleno = 322 (0x142), region = 61 }
  0x27 LB: > { %v158_v2 = vld [vmem:[%s1465_s3 + $0x1e8] sm:$0xff]  ;;  %v157_v3 = vld [vmem:[%s1465_s3 + $0x1e0] sm:$0xff]  ;;  %v906_v6 = vmov 0.0   ;;  %v160_v11 = vld [vmem:[%s1465_s3 + $0x1f8] sm:$0xff]  ;;  %s761_s24 = sshll.u32 %s898_s11, 5  ;;  %s85_s11 = sadd.s32 1, %s898_s11   ;;  %s898_s11 = sphi %s967_s11, %s85_s11  }
  0x28   : > { %v154_v4 = vld [vmem:[%s1465_s3 + $0x1c8] sm:$0xff]  ;;  %161 = vmatprep.subr.mxu0 %v158_v2  ;;  %v153_v5 = vld [vmem:[%s1465_s3 + $0x1c0] sm:$0xff]  ;;  %225 = vmatprep.mubr.f32.mxu0 %v906_v6  ;;  %v159_v13 = vld [vmem:[%s1465_s3 + $0x1f0] sm:$0xff]  ;;  %s92_s25 = scalar_lea.vmem %s960_s9, %s761_s24  ;;  %p84_p12 = scmp.ge.s32.totalorder %s85_s11, %s964_s10 }
  0x29   : > { %162 = vmatpush1.msra.mxu0 %v157_v3  ;;  %v150_v7 = vld [vmem:[%s1465_s3 + $0x1a8] sm:$0xff]  ;;  %296 = vmatprep.mubr.f32.mxu1 %v906_v6  ;;  %v149_v8 = vld [vmem:[%s1465_s3 + $0x1a0] sm:$0xff]  ;;  %v156_v15 = vld [vmem:[%s1465_s3 + $0x1d8] sm:$0xff] }
  0x2a   : > { %163 = vmatprep.subr.mxu0 %v154_v4  ;;  %v146_v9 = vld [vmem:[%s1465_s3 + $0x188] sm:$0xff]  ;;  %v145_v10 = vld [vmem:[%s1465_s3 + $0x180] sm:$0xff]  ;;  %232 = vmatprep.subr.mxu1 %v160_v11  ;;  %v155_v16 = vld [vmem:[%s1465_s3 + $0x1d0] sm:$0xff] }
  0x2b   : > { %164 = vmatpush1.msra.mxu0 %v153_v5  ;;  %v142_v12 = vld [vmem:[%s1465_s3 + $0x168] sm:$0xff]  ;;  %v141_v14 = vld [vmem:[%s1465_s3 + $0x160] sm:$0xff]  ;;  %233 = vmatpush1.msra.mxu1 %v159_v13  ;;  %v152_v18 = vld [vmem:[%s1465_s3 + $0x1b8] sm:$0xff] }
  0x2c   : > { %165 = vmatprep.subr.mxu0 %v150_v7  ;;  %v138_v17 = vld [vmem:[%s1465_s3 + $0x148] sm:$0xff]  ;;  %234 = vmatprep.subr.mxu1 %v156_v15  ;;  %v137_v19 = vld [vmem:[%s1465_s3 + $0x140] sm:$0xff]  ;;  %v151_v20 = vld [vmem:[%s1465_s3 + $0x1b0] sm:$0xff] }
  0x2d   : > { %166 = vmatpush1.msra.mxu0 %v149_v8  ;;  %235 = vmatpush1.msra.mxu1 %v155_v16  ;;  %v148_v21 = vld [vmem:[%s1465_s3 + $0x198] sm:$0xff]  ;;  %v134_v22 = vld [vmem:[%s1465_s3 + $0x128] sm:$0xff]  ;;  %v147_v23 = vld [vmem:[%s1465_s3 + $0x190] sm:$0xff] }
  0x2e   : > { %167 = vmatprep.subr.mxu0 %v146_v9  ;;  %236 = vmatprep.subr.mxu1 %v152_v18  ;;  %v133_v24 = vld [vmem:[%s1465_s3 + $0x120] sm:$0xff]  ;;  %v144_v25 = vld [vmem:[%s1465_s3 + $0x178] sm:$0xff]  ;;  %v130_v26 = vld [vmem:[%s1465_s3 + $0x108] sm:$0xff] }
  0x2f   : > { %168 = vmatpush1.msra.mxu0 %v145_v10  ;;  %237 = vmatpush1.msra.mxu1 %v151_v20  ;;  %v143_v27 = vld [vmem:[%s1465_s3 + $0x170] sm:$0xff]  ;;  %v129_v28 = vld [vmem:[%s1465_s3 + $0x100] sm:$0xff]  ;;  %v140_v29 = vld [vmem:[%s1465_s3 + $0x158] sm:$0xff] }
  0x30   : > { %169 = vmatprep.subr.mxu0 %v142_v12  ;;  %238 = vmatprep.subr.mxu1 %v148_v21  ;;  %v126_v30 = vld [vmem:[%s1465_s3 + $0xe8] sm:$0xff]  ;;  %v139_v31 = vld [vmem:[%s1465_s3 + $0x150] sm:$0xff]  ;;  %v125_v32 = vld [vmem:[%s1465_s3 + $0xe0] sm:$0xff] }
  0x31   : > { %170 = vmatpush1.msra.mxu0 %v141_v14  ;;  %239 = vmatpush1.msra.mxu1 %v147_v23  ;;  %v136_v33 = vld [vmem:[%s1465_s3 + $0x138] sm:$0xff]  ;;  %v122_v34 = vld [vmem:[%s1465_s3 + $0xc8] sm:$0xff]  ;;  %v135_v35 = vld [vmem:[%s1465_s3 + $0x130] sm:$0xff] }
  0x32   : > { %171 = vmatprep.subr.mxu0 %v138_v17  ;;  %240 = vmatprep.subr.mxu1 %v144_v25  ;;  %v121_v36 = vld [vmem:[%s1465_s3 + $0xc0] sm:$0xff]  ;;  %v132_v37 = vld [vmem:[%s1465_s3 + $0x118] sm:$0xff]  ;;  %v118_v38 = vld [vmem:[%s1465_s3 + $0xa8] sm:$0xff] }
  0x33   : > { %172 = vmatpush1.msra.mxu0 %v137_v19  ;;  %241 = vmatpush1.msra.mxu1 %v143_v27  ;;  %v131_v39 = vld [vmem:[%s1465_s3 + $0x110] sm:$0xff]  ;;  %v117_v40 = vld [vmem:[%s1465_s3 + $0xa0] sm:$0xff]  ;;  %v128_v41 = vld [vmem:[%s1465_s3 + $0xf8] sm:$0xff] }
  0x34   : > { %173 = vmatprep.subr.mxu0 %v134_v22  ;;  %242 = vmatprep.subr.mxu1 %v140_v29  ;;  %v114_v42 = vld [vmem:[%s1465_s3 + $0x88] sm:$0xff]  ;;  %v127_v43 = vld [vmem:[%s1465_s3 + $0xf0] sm:$0xff]  ;;  %v113_v44 = vld [vmem:[%s1465_s3 + $0x80] sm:$0xff] }
  0x35   : > { %174 = vmatpush1.msra.mxu0 %v133_v24  ;;  %243 = vmatpush1.msra.mxu1 %v139_v31  ;;  %v124_v45 = vld [vmem:[%s1465_s3 + $0xd8] sm:$0xff]  ;;  %v110_v46 = vld [vmem:[%s1465_s3 + $0x68] sm:$0xff]  ;;  %v123_v47 = vld [vmem:[%s1465_s3 + $0xd0] sm:$0xff] }
  0x36   : > { %175 = vmatprep.subr.mxu0 %v130_v26  ;;  %244 = vmatprep.subr.mxu1 %v136_v33  ;;  %v109_v48 = vld [vmem:[%s1465_s3 + $0x60] sm:$0xff]  ;;  %v120_v49 = vld [vmem:[%s1465_s3 + $0xb8] sm:$0xff]  ;;  %v106_v50 = vld [vmem:[%s1465_s3 + $0x48] sm:$0xff] }
  0x37   : > { %176 = vmatpush1.msra.mxu0 %v129_v28  ;;  %245 = vmatpush1.msra.mxu1 %v135_v35  ;;  %v119_v51 = vld [vmem:[%s1465_s3 + $0xb0] sm:$0xff]  ;;  %v105_v52 = vld [vmem:[%s1465_s3 + $0x40] sm:$0xff]  ;;  %v116_v53 = vld [vmem:[%s1465_s3 + $0x98] sm:$0xff] }
  0x38   : > { %177 = vmatprep.subr.mxu0 %v126_v30  ;;  %246 = vmatprep.subr.mxu1 %v132_v37  ;;  %v102_v54 = vld [vmem:[%s1465_s3 + $0x28] sm:$0xff]  ;;  %v115_v55 = vld [vmem:[%s1465_s3 + $0x90] sm:$0xff]  ;;  %v101_v56 = vld [vmem:[%s1465_s3 + $0x20] sm:$0xff] }
  0x39   : > { %178 = vmatpush1.msra.mxu0 %v125_v32  ;;  %247 = vmatpush1.msra.mxu1 %v131_v39  ;;  %v112_v57 = vld [vmem:[%s1465_s3 + $0x78] sm:$0xff]  ;;  %v98_v58 = vld [vmem:[%s1465_s3 + $0x8] sm:$0xff]  ;;  %v111_v59 = vld [vmem:[%s1465_s3 + $0x70] sm:$0xff] }
  0x3a   : > { %179 = vmatprep.subr.mxu0 %v122_v34  ;;  %248 = vmatprep.subr.mxu1 %v128_v41  ;;  %v97_v60 = vld [vmem:[%s1465_s3] sm:$0xff]  ;;  %v108_v61 = vld [vmem:[%s1465_s3 + $0x58] sm:$0xff]  ;;  %v107_v63 = vld [vmem:[%s1465_s3 + $0x50] sm:$0xff] }
  0x3b   : > { %180 = vmatpush1.msra.mxu0 %v121_v36  ;;  %249 = vmatpush1.msra.mxu1 %v127_v43  ;;  %v88_v62 = vld [vmem:[#allocation2] sm:$0xff]  ;;  %v104_v2 = vld [vmem:[%s1465_s3 + $0x38] sm:$0xff]  ;;  %v103_v3 = vld [vmem:[%s1465_s3 + $0x30] sm:$0xff] }
  0x3c   : > { %181 = vmatprep.subr.mxu0 %v118_v38  ;;  %250 = vmatprep.subr.mxu1 %v124_v45  ;;  %v100_v4 = vld [vmem:[%s1465_s3 + $0x18] sm:$0xff]  ;;  %v99_v5 = vld [vmem:[%s1465_s3 + $0x10] sm:$0xff]  ;;  %v93_v6 = vld [vmem:[%s92_s25] sm:$0xff] }
  0x3d   : > { %182 = vmatpush1.msra.mxu0 %v117_v40  ;;  %251 = vmatpush1.msra.mxu1 %v123_v47  ;;  %v94_v8 = vld [vmem:[%s92_s25 + $0x8] sm:$0xff]  ;;  %v95_v14 = vld [vmem:[%s92_s25 + $0x10] sm:$0xff]  ;;  %v96_v17 = vld [vmem:[%s92_s25 + $0x18] sm:$0xff] }
  0x3e   : > { %183 = vmatprep.subr.mxu0 %v114_v42  ;;  %252 = vmatprep.subr.mxu1 %v120_v49  ;;  %v89_v28 = vld [vmem:[#allocation3] sm:$0xff] }
  0x3f   : > { %184 = vmatpush1.msra.mxu0 %v113_v44  ;;  %253 = vmatpush1.msra.mxu1 %v119_v51 }
  0x40   : > { %185 = vmatprep.subr.mxu0 %v110_v46  ;;  %254 = vmatprep.subr.mxu1 %v116_v53 }
  0x41   : > { %186 = vmatpush1.msra.mxu0 %v109_v48  ;;  %255 = vmatpush1.msra.mxu1 %v115_v55 }
  0x42   : > { %187 = vmatprep.subr.mxu0 %v106_v50  ;;  %256 = vmatprep.subr.mxu1 %v112_v57 }
  0x43   : > { %188 = vmatpush1.msra.mxu0 %v105_v52  ;;  %257 = vmatpush1.msra.mxu1 %v111_v59 }
  0x44   : > { %189 = vmatprep.subr.mxu0 %v102_v54  ;;  %258 = vmatprep.subr.mxu1 %v108_v61 }
  0x45   : > { %190 = vmatpush1.msra.mxu0 %v101_v56  ;;  %259 = vmatpush1.msra.mxu1 %v107_v63 }
  0x46   : > { %191 = vmatprep.subr.mxu0 %v98_v58  ;;  %260 = vmatprep.subr.mxu1 %v104_v2 }
  0x47   : > { %192 = vmatpush1.msra.mxu0 %v97_v60  ;;  %261 = vmatpush1.msra.mxu1 %v103_v3 }
  0x48   : > { %226 = vmatmul.mubr.f32.vlgmr.msra.gmra.mxu0 %v88_v62  ;;  %262 = vmatprep.subr.mxu1 %v100_v4 }
  0x49   : > { %263 = vmatpush1.msra.mxu1 %v99_v5 }
  0x4a   : > { %297 = vmatmul.mubr.f32.vlgmr.msra.gmra.mxu1 %v88_v62 }
 0x108   : > { %v227_v7 = vpop.f32.mrf.mxu0 }
 0x109   : > { %v303_v9 = vadd.f32 %v227_v7, %v93_v6 }
 0x10a   : > { %v229_v10 = vpop.f32.mrf.mxu0  ;;  %v298_v15 = vpop.f32.mrf.mxu1 }
 0x10b   : > { %v748_v11 = vmul.f32 -1.442695, %v303_v9  ;;  %v304_v12 = vadd.f32 %v229_v10, %v94_v8  ;;  %v305_v16 = vadd.f32 %v298_v15, %v95_v14 }
 0x10c   : > { %v300_v18 = vpop.f32.mrf.mxu1 }
 0x10d   : > { %837 = vpow2.f32 %v748_v11  ;;  %v749_v13 = vmul.f32 -1.442695, %v304_v12  ;;  %v750_v19 = vmul.f32 -1.442695, %v305_v16  ;;  %v306_v20 = vadd.f32 %v300_v18, %v96_v17 }
 0x10f   : > { %839 = vpow2.f32 %v749_v13 }
 0x110   : > { %841 = vpow2.f32 %v750_v19 }
 0x111   : > { %843 = vtanh.f32 %v306_v20 }
 0x11a   : > { %v838_v21 = vpop.eup %837 }
 0x11b   : > { %v316_v22 = vadd.f32 1.0, %v838_v21 }
 0x11c   : > { %v840_v23 = vpop.eup %839 }
 0x11d   : > { %845 = vrcp.f32 %v316_v22  ;;  %v317_v24 = vadd.f32 1.0, %v840_v23  ;;  %v842_v25 = vpop.eup %841 }
 0x11e   : > { %v844_v26 = vpop.eup %843  ;;  %v318_v30 = vadd.f32 1.0, %v842_v25 }
 0x11f   : > { %847 = vrcp.f32 %v317_v24 }
 0x120   : > { %849 = vrcp.f32 %v318_v30 }
 0x12a   : > { %v846_v27 = vpop.eup %845 }
 0x12b   : > { %v327_v32 = vmul.f32 %v846_v27, %v844_v26 }
 0x12c   : > { %v848_v29 = vpop.eup %847 }
 0x12d   : > { %v326_v31 = vmul.f32 %v848_v29, %v89_v28  ;;  %v850_v34 = vpop.eup %849 }
 0x12f   : > { %v328_v33 = vadd.f32 %v327_v32, %v326_v31 }
 0x131   : > { %851 = vtanh.f32 %v328_v33  ;;  %332 = vst [vmem:[#allocation3] sm:$0xff] %v328_v33 }
 0x13d   :  { %87 = sbr.rel (!%p84_p12) target bundleno = 39 (0x27), region = 67 }
 0x13e   : > { %v852_v35 = vpop.eup %851 }
 0x13f   : > { %v330_v36 = vmul.f32 %v852_v35, %v850_v34 }
 0x141   : > { %331 = vst [vmem:[#allocation2] sm:$0xff] %v330_v36 }
 0x142 PF:  { %s1172_s26 = ssub.s32 %s1474_s0, %s964_s10 }
 0x143   :  { %p751_p13 = scmp.le.s32.totalorder %s1172_s26, 0 }
 0x144   :  { %s1175_s27 = smov (!%p751_p13), 0  }
 0x145   :  { %731 = sbr.rel (%p751_p13) target bundleno = 614 (0x266), region = 72 }
 0x14a LB: > { %v411_v37 = vld [vmem:[%s1465_s3 + $0x1e8] sm:$0xff]  ;;  %v410_v38 = vld [vmem:[%s1465_s3 + $0x1e0] sm:$0xff]  ;;  %v907_v41 = vmov 0.0   ;;  %v908_v44 = vmov 0   ;;  %v413_v47 = vld [vmem:[%s1465_s3 + $0x1f8] sm:$0xff]  ;;  %s1318_s24 = sadd.s32 %s902_s27, %s964_s10  ;;  %s337_s27 = sadd.s32 1, %s902_s27   ;;  %s902_s27 = sphi %s1175_s27, %s337_s27  }
 0x14b   : > { %v407_v39 = vld [vmem:[%s1465_s3 + $0x1c8] sm:$0xff]  ;;  %414 = vmatprep.subr.mxu0 %v411_v37  ;;  %v406_v40 = vld [vmem:[%s1465_s3 + $0x1c0] sm:$0xff]  ;;  %478 = vmatprep.mubr.f32.mxu0 %v907_v41  ;;  %v412_v49 = vld [vmem:[%s1465_s3 + $0x1f0] sm:$0xff]  ;;  %v585_v28 = vstv %s1318_s24  ;;  %s762_s18 = sshll.u32 %s1318_s24, 5  ;;  %p336_p0 = scmp.ge.s32.totalorder %s337_s27, %s1172_s26 }
 0x14c   : > { %415 = vmatpush1.msra.mxu0 %v410_v38  ;;  %v403_v42 = vld [vmem:[%s1465_s3 + $0x1a8] sm:$0xff]  ;;  %549 = vmatprep.mubr.f32.mxu1 %v907_v41  ;;  %v402_v43 = vld [vmem:[%s1465_s3 + $0x1a0] sm:$0xff]  ;;  %v409_v51 = vld [vmem:[%s1465_s3 + $0x1d8] sm:$0xff]  ;;  %vm586_vm0 = vcmp.gt.s32.totalorder %v951_v0, %v585_v28  ;;  %s345_s19 = scalar_lea.vmem %s960_s9, %s762_s18 }
 0x14d   : > { %416 = vmatprep.subr.mxu0 %v407_v39  ;;  %853 = vset.pattern.permute.xlu0 %v908_v44  ;;  %v399_v45 = vld [vmem:[%s1465_s3 + $0x188] sm:$0xff]  ;;  %v398_v46 = vld [vmem:[%s1465_s3 + $0x180] sm:$0xff]  ;;  %v408_v52 = vld [vmem:[%s1465_s3 + $0x1d0] sm:$0xff] }
 0x14e   : > { %417 = vmatpush1.msra.mxu0 %v406_v40  ;;  %v395_v48 = vld [vmem:[%s1465_s3 + $0x168] sm:$0xff]  ;;  %485 = vmatprep.subr.mxu1 %v413_v47  ;;  %v394_v50 = vld [vmem:[%s1465_s3 + $0x160] sm:$0xff]  ;;  %v405_v54 = vld [vmem:[%s1465_s3 + $0x1b8] sm:$0xff]  ;;  %v587_v40 = vsel %vm586_vm0, 1, %v908_v44 }
 0x14f   : > { %418 = vmatprep.subr.mxu0 %v403_v42  ;;  %486 = vmatpush1.msra.mxu1 %v412_v49  ;;  %v391_v53 = vld [vmem:[%s1465_s3 + $0x148] sm:$0xff]  ;;  %v390_v55 = vld [vmem:[%s1465_s3 + $0x140] sm:$0xff]  ;;  %v404_v56 = vld [vmem:[%s1465_s3 + $0x1b0] sm:$0xff] }
 0x150   : > { %419 = vmatpush1.msra.mxu0 %v402_v43  ;;  %487 = vmatprep.subr.mxu1 %v409_v51  ;;  %v401_v57 = vld [vmem:[%s1465_s3 + $0x198] sm:$0xff]  ;;  %v387_v58 = vld [vmem:[%s1465_s3 + $0x128] sm:$0xff]  ;;  %v400_v59 = vld [vmem:[%s1465_s3 + $0x190] sm:$0xff] }
 0x151   : > { %420 = vmatprep.subr.mxu0 %v399_v45  ;;  %488 = vmatpush1.msra.mxu1 %v408_v52  ;;  %v386_v60 = vld [vmem:[%s1465_s3 + $0x120] sm:$0xff]  ;;  %v397_v61 = vld [vmem:[%s1465_s3 + $0x178] sm:$0xff]  ;;  %v383_v62 = vld [vmem:[%s1465_s3 + $0x108] sm:$0xff] }
 0x152   : > { %421 = vmatpush1.msra.mxu0 %v398_v46  ;;  %489 = vmatprep.subr.mxu1 %v405_v54  ;;  %v396_v63 = vld [vmem:[%s1465_s3 + $0x170] sm:$0xff]  ;;  %v382_v2 = vld [vmem:[%s1465_s3 + $0x100] sm:$0xff]  ;;  %v393_v3 = vld [vmem:[%s1465_s3 + $0x158] sm:$0xff] }
 0x153   : > { %422 = vmatprep.subr.mxu0 %v395_v48  ;;  %490 = vmatpush1.msra.mxu1 %v404_v56  ;;  %v379_v4 = vld [vmem:[%s1465_s3 + $0xe8] sm:$0xff]  ;;  %v392_v5 = vld [vmem:[%s1465_s3 + $0x150] sm:$0xff]  ;;  %v378_v6 = vld [vmem:[%s1465_s3 + $0xe0] sm:$0xff] }
 0x154   : > { %423 = vmatpush1.msra.mxu0 %v394_v50  ;;  %491 = vmatprep.subr.mxu1 %v401_v57  ;;  %v389_v7 = vld [vmem:[%s1465_s3 + $0x138] sm:$0xff]  ;;  %v375_v8 = vld [vmem:[%s1465_s3 + $0xc8] sm:$0xff]  ;;  %v388_v9 = vld [vmem:[%s1465_s3 + $0x130] sm:$0xff] }
 0x155   : > { %424 = vmatprep.subr.mxu0 %v391_v53  ;;  %492 = vmatpush1.msra.mxu1 %v400_v59  ;;  %v374_v10 = vld [vmem:[%s1465_s3 + $0xc0] sm:$0xff]  ;;  %v385_v11 = vld [vmem:[%s1465_s3 + $0x118] sm:$0xff]  ;;  %v371_v12 = vld [vmem:[%s1465_s3 + $0xa8] sm:$0xff] }
 0x156   : > { %425 = vmatpush1.msra.mxu0 %v390_v55  ;;  %493 = vmatprep.subr.mxu1 %v397_v61  ;;  %v384_v13 = vld [vmem:[%s1465_s3 + $0x110] sm:$0xff]  ;;  %v370_v14 = vld [vmem:[%s1465_s3 + $0xa0] sm:$0xff]  ;;  %v381_v15 = vld [vmem:[%s1465_s3 + $0xf8] sm:$0xff] }
 0x157   : > { %426 = vmatprep.subr.mxu0 %v387_v58  ;;  %494 = vmatpush1.msra.mxu1 %v396_v63  ;;  %v367_v16 = vld [vmem:[%s1465_s3 + $0x88] sm:$0xff]  ;;  %v380_v17 = vld [vmem:[%s1465_s3 + $0xf0] sm:$0xff]  ;;  %v366_v18 = vld [vmem:[%s1465_s3 + $0x80] sm:$0xff] }
 0x158   : > { %427 = vmatpush1.msra.mxu0 %v386_v60  ;;  %495 = vmatprep.subr.mxu1 %v393_v3  ;;  %v377_v19 = vld [vmem:[%s1465_s3 + $0xd8] sm:$0xff]  ;;  %v363_v20 = vld [vmem:[%s1465_s3 + $0x68] sm:$0xff]  ;;  %v376_v21 = vld [vmem:[%s1465_s3 + $0xd0] sm:$0xff] }
 0x159   : > { %428 = vmatprep.subr.mxu0 %v383_v62  ;;  %496 = vmatpush1.msra.mxu1 %v392_v5  ;;  %v362_v22 = vld [vmem:[%s1465_s3 + $0x60] sm:$0xff]  ;;  %v373_v23 = vld [vmem:[%s1465_s3 + $0xb8] sm:$0xff]  ;;  %v359_v24 = vld [vmem:[%s1465_s3 + $0x48] sm:$0xff] }
 0x15a   : > { %429 = vmatpush1.msra.mxu0 %v382_v2  ;;  %497 = vmatprep.subr.mxu1 %v389_v7  ;;  %v372_v25 = vld [vmem:[%s1465_s3 + $0xb0] sm:$0xff]  ;;  %v358_v26 = vld [vmem:[%s1465_s3 + $0x40] sm:$0xff]  ;;  %v369_v27 = vld [vmem:[%s1465_s3 + $0x98] sm:$0xff] }
 0x15b   : > { %430 = vmatprep.subr.mxu0 %v379_v4  ;;  %498 = vmatpush1.msra.mxu1 %v388_v9  ;;  %v355_v29 = vld [vmem:[%s1465_s3 + $0x28] sm:$0xff]  ;;  %v368_v30 = vld [vmem:[%s1465_s3 + $0x90] sm:$0xff]  ;;  %v354_v31 = vld [vmem:[%s1465_s3 + $0x20] sm:$0xff] }
 0x15c   : > { %431 = vmatpush1.msra.mxu0 %v378_v6  ;;  %499 = vmatprep.subr.mxu1 %v385_v11  ;;  %v365_v32 = vld [vmem:[%s1465_s3 + $0x78] sm:$0xff]  ;;  %v351_v33 = vld [vmem:[%s1465_s3 + $0x8] sm:$0xff]  ;;  %v364_v34 = vld [vmem:[%s1465_s3 + $0x70] sm:$0xff] }
 0x15d   : > { %432 = vmatprep.subr.mxu0 %v375_v8  ;;  %500 = vmatpush1.msra.mxu1 %v384_v13  ;;  %v350_v35 = vld [vmem:[%s1465_s3] sm:$0xff]  ;;  %v361_v36 = vld [vmem:[%s1465_s3 + $0x58] sm:$0xff]  ;;  %v360_v38 = vld [vmem:[%s1465_s3 + $0x50] sm:$0xff] }
 0x15e   : > { %433 = vmatpush1.msra.mxu0 %v374_v10  ;;  %501 = vmatprep.subr.mxu1 %v381_v15  ;;  %v1364_v37 = vld [vmem:[#allocation2] sm:$0xff]  ;;  %v357_v39 = vld [vmem:[%s1465_s3 + $0x38] sm:$0xff]  ;;  %v356_v41 = vld [vmem:[%s1465_s3 + $0x30] sm:$0xff] }
 0x15f   : > { %434 = vmatprep.subr.mxu0 %v371_v12  ;;  %502 = vmatpush1.msra.mxu1 %v380_v17  ;;  %v353_v42 = vld [vmem:[%s1465_s3 + $0x18] sm:$0xff]  ;;  %v352_v43 = vld [vmem:[%s1465_s3 + $0x10] sm:$0xff]  ;;  %v346_v44 = vld [vmem:[%s345_s19] sm:$0xff] }
 0x160   : > { %435 = vmatpush1.msra.mxu0 %v370_v14  ;;  %503 = vmatprep.subr.mxu1 %v377_v19  ;;  %v347_v46 = vld [vmem:[%s345_s19 + $0x8] sm:$0xff]  ;;  %v348_v52 = vld [vmem:[%s345_s19 + $0x10] sm:$0xff]  ;;  %v349_v55 = vld [vmem:[%s345_s19 + $0x18] sm:$0xff] }
 0x161   : > { %436 = vmatprep.subr.mxu0 %v367_v16  ;;  %504 = vmatpush1.msra.mxu1 %v376_v21  ;;  %v342_v4 = vld [vmem:[#allocation3] sm:$0xff] }
 0x162   : > { %437 = vmatpush1.msra.mxu0 %v366_v18  ;;  %505 = vmatprep.subr.mxu1 %v373_v23 }
 0x163   : > { %438 = vmatprep.subr.mxu0 %v363_v20  ;;  %506 = vmatpush1.msra.mxu1 %v372_v25 }
 0x164   : > { %439 = vmatpush1.msra.mxu0 %v362_v22  ;;  %507 = vmatprep.subr.mxu1 %v369_v27 }
 0x165   : > { %440 = vmatprep.subr.mxu0 %v359_v24  ;;  %508 = vmatpush1.msra.mxu1 %v368_v30 }
 0x166   : > { %441 = vmatpush1.msra.mxu0 %v358_v26  ;;  %509 = vmatprep.subr.mxu1 %v365_v32 }
 0x167   : > { %442 = vmatprep.subr.mxu0 %v355_v29  ;;  %510 = vmatpush1.msra.mxu1 %v364_v34 }
 0x168   : > { %443 = vmatpush1.msra.mxu0 %v354_v31  ;;  %511 = vmatprep.subr.mxu1 %v361_v36 }
 0x169   : > { %444 = vmatprep.subr.mxu0 %v351_v33  ;;  %512 = vmatpush1.msra.mxu1 %v360_v38 }
 0x16a   : > { %445 = vmatpush1.msra.mxu0 %v350_v35  ;;  %513 = vmatprep.subr.mxu1 %v357_v39 }
 0x16b   : > { %479 = vmatmul.mubr.f32.vlgmr.msra.gmra.mxu0 %v1364_v37  ;;  %589 = vperm.xlu0 %853, %v587_v40  }
 0x16c   : > { %514 = vmatpush1.msra.mxu1 %v356_v41 }
 0x16d   : > { %515 = vmatprep.subr.mxu1 %v353_v42 }
 0x16e   : > { %516 = vmatpush1.msra.mxu1 %v352_v43 }
 0x16f   : > { %550 = vmatmul.mubr.f32.vlgmr.msra.gmra.mxu1 %v1364_v37 }
 0x1e6   : > { %v590_v5 = vpop.permute.xlu0 %589 }
 0x1e7   : > { %vm591_vm1 = vcmp.eq.s32.totalorder %v590_v5, 1 }
 0x22b   : > { %v480_v45 = vpop.f32.mrf.mxu0 }
 0x22c   : > { %v556_v47 = vadd.f32 %v480_v45, %v346_v44 }
 0x22d   : > { %v482_v48 = vpop.f32.mrf.mxu0 }
 0x22e   : > { %v754_v49 = vmul.f32 -1.442695, %v556_v47  ;;  %v557_v50 = vadd.f32 %v482_v48, %v347_v46 }
 0x22f   : > { %v551_v53 = vpop.f32.mrf.mxu1 }
 0x230   : > { %854 = vpow2.f32 %v754_v49  ;;  %v755_v51 = vmul.f32 -1.442695, %v557_v50  ;;  %v558_v54 = vadd.f32 %v551_v53, %v348_v52 }
 0x231   : > { %v553_v56 = vpop.f32.mrf.mxu1 }
 0x232   : > { %856 = vpow2.f32 %v755_v51  ;;  %v756_v57 = vmul.f32 -1.442695, %v558_v54  ;;  %v559_v58 = vadd.f32 %v553_v56, %v349_v55 }
 0x234   : > { %858 = vpow2.f32 %v756_v57 }
 0x235   : > { %860 = vtanh.f32 %v559_v58 }
 0x23d   : > { %v855_v59 = vpop.eup %854 }
 0x23e   : > { %v569_v60 = vadd.f32 1.0, %v855_v59 }
 0x23f   : > { %v857_v61 = vpop.eup %856 }
 0x240   : > { %862 = vrcp.f32 %v569_v60  ;;  %v570_v62 = vadd.f32 1.0, %v857_v61 }
 0x241   : > { %v859_v63 = vpop.eup %858 }
 0x242   : > { %864 = vrcp.f32 %v570_v62  ;;  %v861_v2 = vpop.eup %860  ;;  %v571_v7 = vadd.f32 1.0, %v859_v63 }
 0x244   : > { %866 = vrcp.f32 %v571_v7 }
 0x24d   : > { %v863_v3 = vpop.eup %862 }
 0x24e   : > { %v580_v9 = vmul.f32 %v863_v3, %v861_v2 }
 0x24f   : > { %v865_v6 = vpop.eup %864 }
 0x250   : > { %v579_v8 = vmul.f32 %v865_v6, %v342_v4 }
 0x251   : > { %v867_v12 = vpop.eup %866 }
 0x252   : > { %v581_v10 = vadd.f32 %v580_v9, %v579_v8 }
 0x254   : > { %868 = vtanh.f32 %v581_v10  ;;  %v593_v11 = vsel %vm591_vm1, %v581_v10, %v342_v4 }
 0x255   : > { %595 = vst [vmem:[#allocation3] sm:$0xff] %v593_v11 }
 0x261   : > { %v869_v13 = vpop.eup %868  ;;  %339 = sbr.rel (!%p336_p0) target bundleno = 330 (0x14a), region = 78 }
 0x262   : > { %v583_v14 = vmul.f32 %v869_v13, %v867_v12 }
 0x264   : > { %v592_v15 = vsel %vm591_vm1, %v583_v14, %v1364_v37 }
 0x265   : > { %594 = vst [vmem:[#allocation2] sm:$0xff] %v592_v15 }
 0x266 PF:  { %780 = vmatprep.subr.mxu0 %v905_v1  ;;  %v615_v16 = vld [vmem:[%s1466_s4 + $0x78] sm:$0xff]  ;;  %v614_v17 = vld [vmem:[%s1466_s4 + $0x70] sm:$0xff]  ;;  %vm909_vm2 = vmmov 0   ;;  %v613_v0 = vld [vmem:[%s1466_s4 + $0x68] sm:$0xff]  ;;  %v693_v32 = vlaneseq }
 0x267   :  { %781 = vmatpush3.msra.mxu0 %v615_v16  ;;  %812 = vmatprep.mubr.msk.f32.mxu0 %vm909_vm2, %v905_v1  ;;  %v612_v18 = vld [vmem:[%s1466_s4 + $0x60] sm:$0xff]  ;;  %v611_v19 = vld [vmem:[%s1466_s4 + $0x58] sm:$0xff]  ;;  %v610_v20 = vld [vmem:[%s1466_s4 + $0x50] sm:$0xff] }
 0x268   :  { %782 = vmatprep.subr.mxu0 %v905_v1  ;;  %v609_v21 = vld [vmem:[%s1466_s4 + $0x48] sm:$0xff]  ;;  %v608_v22 = vld [vmem:[%s1466_s4 + $0x40] sm:$0xff]  ;;  %v607_v23 = vld [vmem:[%s1466_s4 + $0x38] sm:$0xff]  ;;  %v694_v33 = vand.u32 127, %v693_v32 }
 0x269   :  { %783 = vmatpush3.msra.mxu0 %v614_v17  ;;  %v606_v24 = vld [vmem:[%s1466_s4 + $0x30] sm:$0xff]  ;;  %v605_v25 = vld [vmem:[%s1466_s4 + $0x28] sm:$0xff]  ;;  %v604_v26 = vld [vmem:[%s1466_s4 + $0x20] sm:$0xff] }
 0x26a   :  { %784 = vmatprep.subr.mxu0 %v905_v1  ;;  %v603_v27 = vld [vmem:[%s1466_s4 + $0x18] sm:$0xff]  ;;  %v602_v28 = vld [vmem:[%s1466_s4 + $0x10] sm:$0xff]  ;;  %v601_v29 = vld [vmem:[%s1466_s4 + $0x8] sm:$0xff]  ;;  %vm695_vm3 = vcmp.lt.s32.totalorder %v694_v33, 5 }
 0x26b   :  { %785 = vmatpush3.msra.mxu0 %v613_v0  ;;  %v600_v30 = vld [vmem:[%s1466_s4] sm:$0xff] }
 0x26c   :  { %786 = vmatprep.subr.mxu0 %v905_v1  ;;  %v599_v31 = vld [vmem:[#allocation2] sm:$0xff] }
 0x26d   :  { %787 = vmatpush3.msra.mxu0 %v612_v18  ;;  %v757_v34 = vld [vmem:[%s1467_s5] ss:$0 sm:$0xff] }
 0x26e   :  { %788 = vmatprep.subr.mxu0 %v905_v1 }
 0x26f   :  { %789 = vmatpush3.msra.mxu0 %v611_v19 }
 0x270   :  { %790 = vmatprep.subr.mxu0 %v905_v1 }
 0x271   :  { %791 = vmatpush3.msra.mxu0 %v610_v20 }
 0x272   :  { %792 = vmatprep.subr.mxu0 %v905_v1 }
 0x273   :  { %793 = vmatpush3.msra.mxu0 %v609_v21 }
 0x274   :  { %794 = vmatprep.subr.mxu0 %v905_v1 }
 0x275   :  { %795 = vmatpush3.msra.mxu0 %v608_v22 }
 0x276   :  { %796 = vmatprep.subr.mxu0 %v905_v1 }
 0x277   :  { %797 = vmatpush3.msra.mxu0 %v607_v23 }
 0x278   :  { %798 = vmatprep.subr.mxu0 %v905_v1 }
 0x279   :  { %799 = vmatpush3.msra.mxu0 %v606_v24 }
 0x27a   :  { %800 = vmatprep.subr.mxu0 %v905_v1 }
 0x27b   :  { %801 = vmatpush3.msra.mxu0 %v605_v25 }
 0x27c   :  { %802 = vmatprep.subr.mxu0 %v905_v1 }
 0x27d   :  { %803 = vmatpush3.msra.mxu0 %v604_v26 }
 0x27e   :  { %804 = vmatprep.subr.mxu0 %v905_v1 }
 0x27f   :  { %805 = vmatpush3.msra.mxu0 %v603_v27 }
 0x280   :  { %806 = vmatprep.subr.mxu0 %v905_v1 }
 0x281   :  { %807 = vmatpush3.msra.mxu0 %v602_v28 }
 0x282   :  { %808 = vmatprep.subr.mxu0 %v905_v1 }
 0x283   :  { %809 = vmatpush3.msra.mxu0 %v601_v29 }
 0x284   :  { %810 = vmatprep.subr.mxu0 %v905_v1 }
 0x285   :  { %811 = vmatpush3.msra.mxu0 %v600_v30 }
 0x286   :  { %813 = vmatmul.mubr.f32.vlgmr.msra.gmra.mxu0 %v599_v31 }
 0x346   :  { %v689_v35 = vpop.f32.mrf.mxu0 }
 0x347   :  { %v690_v36 = vadd.f32 %v757_v34, %v689_v35 }
 0x348   :  { %v814_v37 = vpop.f32.mrf.mxu0 }
 0x349   :  { %v696_v38 = vsel %vm695_vm3, %v690_v36, -1e+30 }
 0x34a   :  { %697 = vmax.xlane.f32.xlu0 %v696_v38 }
 0x3d3   :  { %v698_v39 = vpop.xlane.xlu0 %697 }
 0x3d4   :  { %v699_v40 = vsub.f32 %v696_v38, %v698_v39 }
 0x3d6   :  { %v700_v41 = vmul.f32 1.442695, %v699_v40 }
 0x3d8   :  { %870 = vpow2.f32 %v700_v41 }
 0x3e5   :  { %v871_v42 = vpop.eup %870 }
 0x3e6   :  { %702 = vadd.xlane.f32.xlu0 %v871_v42 }
 0x46f   :  { %v703_v1 = vpop.xlane.xlu0 %702 }
 0x470   :  { %872 = vlog2.f32 %v703_v1 }
 0x47d   :  { %v873_v43 = vpop.eup %872 }
 0x47e   :  { %v705_v44 = vmul.f32 0.6931472, %v873_v43 }
 0x480   :  { %v706_v45 = vadd.f32 %v705_v44, %v698_v39 }
 0x482   :  { %v707_v46 = vsub.f32 %v696_v38, %v706_v45 }
 0x484   :  { %708 = vst [vmem:[%s1468_s6] sm:$0xff] %v707_v46 }

</bundles_post_ra>
